<compile_context>
chip_gen: v6e
topology: v6e:2x2x1
jax: 0.10.0
libtpu: 0.0.40
codegen_flags: <defaults>
</compile_context>

<pallas_src>
import functools

import jax
import jax.numpy as jnp
from jax.experimental import pallas as pl
from jax.experimental.pallas import tpu as pltpu


def _compute_mtl(losses, lv, w):
    """f32 elementwise core: exp(-log_vars) * (losses [* weight]) + log_vars."""
    if w is not None:
        losses = losses * w
    return jnp.exp(-lv) * losses + lv


def _mtl_none_kernel(*refs, has_weight):
    # refs: losses_ref, lv_ref, [w_ref], out_ref   (all (1, N) VMEM)
    if has_weight:
        losses_ref, lv_ref, w_ref, out_ref = refs
        w = w_ref[...]
    else:
        losses_ref, lv_ref, out_ref = refs
        w = None
    mtl = _compute_mtl(losses_ref[...], lv_ref[...], w)  # f32
    out_ref[...] = mtl.astype(out_ref.dtype)


def _mtl_reduce_kernel(*refs, has_weight, scale):
    # refs: losses_ref, lv_ref, [w_ref], out_ref
    # out_ref: (1,) float32 scalar in SMEM (32-bit scalar path, always safe).
    if has_weight:
        losses_ref, lv_ref, w_ref, out_ref = refs
        w = w_ref[...]
    else:
        losses_ref, lv_ref, out_ref = refs
        w = None
    mtl = _compute_mtl(losses_ref[...], lv_ref[...], w)  # f32
    s = jnp.sum(mtl)                                     # f32 accumulation
    if scale != 1.0:                                     # compile-time const (mean)
        s = s * scale
    out_ref[0] = s                                       # f32 SMEM store


def _mtl_fused_kernel(*refs, has_weight):
    # refs: losses_ref, lv_ref, [w_ref], vec_out_ref (VMEM), sum_out_ref (SMEM f32)
    if has_weight:
        losses_ref, lv_ref, w_ref, vec_ref, sum_ref = refs
        w = w_ref[...]
    else:
        losses_ref, lv_ref, vec_ref, sum_ref = refs
        w = None
    mtl = _compute_mtl(losses_ref[...], lv_ref[...], w)  # f32
    vec_ref[...] = mtl.astype(vec_ref.dtype)
    sum_ref[0] = jnp.sum(mtl)                            # f32 SMEM store


def _prepare_inputs(losses, log_vars, weight):
    losses = jnp.asarray(losses)
    log_vars = jnp.asarray(log_vars)
    num_tasks = losses.shape[-1]
    out_dtype = jnp.promote_types(losses.dtype, log_vars.dtype)
    has_weight = weight is not None
    args = [
        losses.astype(jnp.float32).reshape(1, num_tasks),
        log_vars.astype(jnp.float32).reshape(1, num_tasks),
    ]
    if has_weight:
        args.append(jnp.asarray(weight, dtype=jnp.float32).reshape(1, num_tasks))
    return args, num_tasks, out_dtype, has_weight


def _cost(num_tasks, n_in, out_bytes, has_weight, reduced):
    flops = (4 if has_weight else 3) * num_tasks + (num_tasks if reduced else 0)
    return pl.CostEstimate(
        flops=flops,
        transcendentals=num_tasks,
        bytes_accessed=n_in * num_tasks * 4 + out_bytes,
    )


_VMEM = pl.BlockSpec(memory_space=pltpu.MemorySpace.VMEM)
_SMEM = pl.BlockSpec(memory_space=pltpu.MemorySpace.SMEM)


def multitask_loss(losses, log_vars, weight=None, reduction="none"):
    """JAX/Pallas equivalent of MultiTaskLoss.forward."""
    args, num_tasks, out_dtype, has_weight = _prepare_inputs(losses, log_vars, weight)
    n_in = len(args)
    out_itemsize = jnp.dtype(out_dtype).itemsize

    if reduction == "none":
        out = pl.pallas_call(
            functools.partial(_mtl_none_kernel, has_weight=has_weight),
            out_shape=jax.ShapeDtypeStruct((1, num_tasks), out_dtype),
            in_specs=[_VMEM] * n_in,
            out_specs=_VMEM,
            cost_estimate=_cost(num_tasks, n_in, num_tasks * out_itemsize,
                                has_weight, reduced=False),
        )(*args)
        return out.reshape(num_tasks)
    elif reduction in ("sum", "mean"):
        scale = (1.0 / num_tasks) if reduction == "mean" else 1.0
        out = pl.pallas_call(
            functools.partial(_mtl_reduce_kernel, has_weight=has_weight, scale=scale),
            out_shape=jax.ShapeDtypeStruct((1,), jnp.float32),  # always f32 in SMEM
            in_specs=[_VMEM] * n_in,
            out_specs=_SMEM,
            cost_estimate=_cost(num_tasks, n_in, 4, has_weight, reduced=True),
        )(*args)
        # 0-d cast to the torch-promoted dtype is free.
        return out.reshape(()).astype(out_dtype)
    else:
        raise ValueError("Keyword 'reduction' must be one of ['none', 'mean', 'sum']")


def multitask_loss_fused(losses, log_vars, weight=None):
    """One pallas_call returning (per_task_losses, sum) — use when both are needed.

    mean, if wanted, is sum / num_tasks (free 0-d op in the wrapper).
    """
    args, num_tasks, out_dtype, has_weight = _prepare_inputs(losses, log_vars, weight)
    n_in = len(args)
    out_itemsize = jnp.dtype(out_dtype).itemsize

    vec, s = pl.pallas_call(
        functools.partial(_mtl_fused_kernel, has_weight=has_weight),
        out_shape=(
            jax.ShapeDtypeStruct((1, num_tasks), out_dtype),
            jax.ShapeDtypeStruct((1,), jnp.float32),
        ),
        in_specs=[_VMEM] * n_in,
        out_specs=(_VMEM, _SMEM),
        cost_estimate=_cost(num_tasks, n_in, num_tasks * out_itemsize + 4,
                            has_weight, reduced=True),
    )(*args)
    return vec.reshape(num_tasks), s.reshape(()).astype(out_dtype)


if __name__ == "__main__":
    num_tasks = 8

    key = jax.random.PRNGKey(0)
    k_losses, k_weight = jax.random.split(key)

    # Per-task losses (e.g. outputs of individual task losses).
    losses = jax.random.uniform(k_losses, (num_tasks,), dtype=jnp.float32) * 2.0
    weight = jax.random.uniform(k_weight, (num_tasks,), dtype=jnp.float32) + 0.5

    # Parameter init matches reset_parameters(): zeros.
    log_vars = jnp.zeros((num_tasks,), dtype=jnp.float32)

    out_none = jax.block_until_ready(
        multitask_loss(losses, log_vars, weight=weight, reduction="none"))
    out_sum = jax.block_until_ready(
        multitask_loss(losses, log_vars, weight=weight, reduction="sum"))
    out_mean = jax.block_until_ready(
        multitask_loss(losses, log_vars, weight=weight, reduction="mean"))
    out_noweight = jax.block_until_ready(
        multitask_loss(losses, log_vars, weight=None, reduction="none"))
    fused_vec, fused_sum = jax.block_until_ready(
        multitask_loss_fused(losses, log_vars, weight=weight))

    # Reference check in plain JAX.
    ref_none = jnp.exp(-log_vars) * (losses * weight) + log_vars
    ref_noweight = jnp.exp(-log_vars) * losses + log_vars
    assert jnp.allclose(out_none, ref_none, atol=1e-6)
    assert jnp.allclose(out_sum, ref_none.sum(), atol=1e-5)
    assert jnp.allclose(out_mean, ref_none.mean(), atol=1e-6)
    assert jnp.allclose(out_noweight, ref_noweight, atol=1e-6)
    assert jnp.allclose(fused_vec, ref_none, atol=1e-6)
    assert jnp.allclose(fused_sum, ref_none.sum(), atol=1e-5)

    print("KERNEL_OK")
</pallas_src>

<mosaic_0001>
module attributes {stable_mosaic.version = 11 : i64} {
  func.func @_mtl_none_kernel(%arg0: memref<1x8xf32, #tpu.memory_space<vmem>>, %arg1: memref<1x8xf32, #tpu.memory_space<vmem>>, %arg2: memref<1x8xf32, #tpu.memory_space<vmem>>, %arg3: memref<1x8xf32, #tpu.memory_space<vmem>>) attributes {dimension_semantics = [], scalar_prefetch = 0 : i64, scratch_operands = 0 : i64, tpu.core_type = #tpu.core_type<tc>} {
    %c0 = arith.constant 0 : index
    %c0_0 = arith.constant 0 : index
    %0 = vector.load %arg2[%c0, %c0_0] : memref<1x8xf32, #tpu.memory_space<vmem>>, vector<1x8xf32>
    %c0_1 = arith.constant 0 : index
    %c0_2 = arith.constant 0 : index
    %1 = vector.load %arg0[%c0_1, %c0_2] : memref<1x8xf32, #tpu.memory_space<vmem>>, vector<1x8xf32>
    %c0_3 = arith.constant 0 : index
    %c0_4 = arith.constant 0 : index
    %2 = vector.load %arg1[%c0_3, %c0_4] : memref<1x8xf32, #tpu.memory_space<vmem>>, vector<1x8xf32>
    %3 = arith.mulf %1, %0 : vector<1x8xf32>
    %cst = arith.constant 0.000000e+00 : f32
    %4 = vector.broadcast %cst : f32 to vector<1x8xf32>
    %5 = arith.subf %4, %2 : vector<1x8xf32>
    %6 = math.exp %5 : vector<1x8xf32>
    %7 = arith.mulf %6, %3 : vector<1x8xf32>
    %8 = arith.addf %7, %2 : vector<1x8xf32>
    %c0_5 = arith.constant 0 : index
    %c0_6 = arith.constant 0 : index
    %9 = vector.load %arg3[%c0_5, %c0_6] : memref<1x8xf32, #tpu.memory_space<vmem>>, vector<1x8xf32>
    tpu.vector_store %arg3[%c0_5, %c0_6], %8 {strides = array<i32>} : memref<1x8xf32, #tpu.memory_space<vmem>>, vector<1x8xf32>,
    return
  }
}

</mosaic_0001>

<bundles_post_ra>
// kernel: tpu_custom_call.1
= control target key start
LH: loop header
LB: loop body
LE: loop exit
PB: predicated region body
PF: predicated region fallthrough
CT: control target
= control target key end

     0   :  { %8 = vsyncpa [#allocation3], 0  ;;  %s135_s0 = inlined_call_operand.hbm [shape: f32[1,8], index: 0, kind: input, shape index: {}]   ;;  %s136_s1 = inlined_call_operand.vmem [shape: f32[1,8], index: 1, kind: input, shape index: {}]   ;;  %s137_s2 = inlined_call_operand.vmem [shape: f32[1,8], index: 2, kind: input, shape index: {}]   ;;  %s138_s3 = inlined_call_operand.hbm [shape: f32[1,8], index: 3, kind: output, shape index: {}]  }
   0x1   :  { %9 = vsyncpa [#allocation4], 0  ;;  %s101_s12 = smov [#allocation2]  }
   0x2   :  { %s16_s13 = sshll.u32 %s101_s12, 4  ;;  %s17_s13 = int_to_ptr.vmem [resolvable:$true] %s16_s13 }
   0x3   :  { %s65_s14 = scalar_lea.vmem %s17_s13, 16  ;;  %s69_s15 = scalar_lea.vmem %s17_s13, 32 }
   0x4   :  { %p66_p0 = scmp.ne.s32.totalorder %s17_s13, %s65_s14  ;;  %p70_p1 = scmp.lt.s32.totalorder %s17_s13, %s17_s13 }
   0x5   :  { %p71_p2 = scmp.lt.s32.totalorder %s69_s15, %s65_s14 }
   0x7   :  { %p72_p3 = por %p71_p2, %p70_p1 }
   0x9   :  { %p73_p4 = pnand %p72_p3, %p66_p0 }
   0xb   :  { %76 = shalt.err (!%p73_p4)
}
   0xc   :  { %19 = dma.hbm_to_vmem [thread:$0]  %s135_s0, 16, %s17_s13, [#allocation3]  }
   0xd   :  { %97 = dma.done.wait [#allocation3], 16  }
   0xe   :  { %98 = vsyncadd [#allocation3], 4294967280  ;;  %v29_v0 = vld [vmem:[%s136_s1] sm:$0x1]  ;;  %s102_s22 = smov [#allocation5]   ;;  %vm36_vm0 = vcmask 57344  }
   0xf   :  { %v31_v1 = vsub.f32 0.0, %v29_v0  ;;  %v27_v3 = vld [vmem:[%s137_s2] sm:$0x1]  ;;  %s44_s23 = sshll.u32 %s102_s22, 4  ;;  %s45_s23 = int_to_ptr.vmem [resolvable:$true] %s44_s23 }
  0x10   :  { %v28_v4 = vld [vmem:[#allocation2] sm:$0x1]  ;;  %s77_s0 = scalar_lea.vmem %s45_s23, 16  ;;  %s81_s1 = scalar_lea.vmem %s45_s23, 32 }
  0x11   :  { %v32_v2 = vmul.f32 1.442695, %v31_v1  ;;  %v30_v5 = vmul.f32 %v28_v4, %v27_v3  ;;  %p78_p5 = scmp.ne.s32.totalorder %s45_s23, %s77_s0  ;;  %p82_p6 = scmp.lt.s32.totalorder %s45_s23, %s45_s23 }
  0x12   :  { %p83_p7 = scmp.lt.s32.totalorder %s81_s1, %s77_s0 }
  0x13   :  { %55 = vpow2.f32 %v32_v2 }
  0x14   :  { %p84_p8 = por %p83_p7, %p82_p6 }
  0x16   :  { %p85_p9 = pnand %p84_p8, %p78_p5 }
  0x20   :  { %v56_v6 = vpop.eup %55 }
  0x21   :  { %v34_v7 = vmul.f32 %v56_v6, %v30_v5 }
  0x23   :  { %v35_v8 = vadd.f32 %v34_v7, %v29_v0 }
  0x25   :  { %37 = vst.msk [vmem:[#allocation5] sm:$0x1] %vm36_vm0, %v35_v8 }
  0x26   :  { %88 = shalt.err (!%p85_p9)
}
  0x27   :  { %47 = dma.vmem_to_hbm [thread:$0]  %s45_s23, 16, %s138_s3, [#allocation4]  }
  0x28   :  { %99 = dma.done.wait [#allocation4], 16  }
  0x29   :  { %100 = vsyncadd [#allocation4], 4294967280 }
  0x2a   :  { %51 = vsyncpa [#allocation3], 1 }
  0x2b   :  { %52 = vsyncpa [#allocation4], 1 }

</bundles_post_ra>
